<compile_context>
chip_gen: v7x
topology: tpu7x:2x2x1
jax: 0.10.0
libtpu: 0.0.40
codegen_flags: <defaults>
</compile_context>

<pallas_src>
import functools

import jax
import jax.numpy as jnp
import numpy as np
from jax.experimental import pallas as pl
from jax.experimental.pallas import tpu as pltpu

EPS = float(jnp.finfo(jnp.float32).eps)   # == torch.finfo(torch.float32).eps
S_ACC = 8                                 # score axis of the resized accumulator
                                          # (padded 5 -> 8: native (8,128) sublane tile)


# --------------------------------------------------------------------------
# Kernel A: fused  softmax(logits)[:, tc] * IoU(boxes[:, tc], target_box)
#           + argmax over proposals (lane axis).  Exact divisions for parity.
#   lane-dense layout: logits (C+1, N), boxes (4, N); output: (1,) int32 SMEM
# --------------------------------------------------------------------------
def _select_kernel(logits_ref, boxes_ref, tbox_ref, idx_ref, *, target_class):
    x = logits_ref[...]                                  # (C+1, N)
    m = jnp.max(x, axis=0, keepdims=True)                # (1, N)
    e = jnp.exp(x - m)
    denom = jnp.sum(e, axis=0, keepdims=True)            # (1, N)
    score = e[target_class:target_class + 1, :] / denom  # exact division

    x1 = boxes_ref[0:1, :]
    y1 = boxes_ref[1:2, :]
    x2 = boxes_ref[2:3, :]
    y2 = boxes_ref[3:4, :]
    tx1 = tbox_ref[0]
    ty1 = tbox_ref[1]
    tx2 = tbox_ref[2]
    ty2 = tbox_ref[3]
    inter_w = jnp.maximum(jnp.minimum(x2, tx2) - jnp.maximum(x1, tx1), 0.0)
    inter_h = jnp.maximum(jnp.minimum(y2, ty2) - jnp.maximum(y1, ty1), 0.0)
    inter_area = inter_w * inter_h
    box_area = (x2 - x1) * (y2 - y1)
    target_area = (tx2 - tx1) * (ty2 - ty1)
    union_area = box_area + target_area - inter_area
    iou = inter_area / union_area                        # exact, matches reference
    w = iou * score                                      # (1, N)

    # fused argmax (first occurrence of the max, matching torch.argmax)
    best = jnp.max(w)
    lane = jax.lax.broadcasted_iota(jnp.int32, w.shape, 1)
    n = w.shape[1]
    idx_ref[0] = jnp.min(jnp.where(w == best, lane, n))


def select_proposal_pallas(logits_t, boxes_t, target_box, target_class):
    # logits_t: (C+1, N) f32, boxes_t: (4, N) f32, target_box: (4,) f32 (SMEM)
    kernel = functools.partial(_select_kernel, target_class=int(target_class))
    return pl.pallas_call(
        kernel,
        out_shape=jax.ShapeDtypeStruct((1,), jnp.int32),
        in_specs=[
            pl.BlockSpec(memory_space=pltpu.MemorySpace.VMEM),
            pl.BlockSpec(memory_space=pltpu.MemorySpace.VMEM),
            pl.BlockSpec(memory_space=pltpu.MemorySpace.SMEM),
        ],
        out_specs=pl.BlockSpec(memory_space=pltpu.MemorySpace.SMEM),
    )(logits_t, boxes_t, target_box)


# --------------------------------------------------------------------------
# Kernel B: per-FPN-level CAM + normalize + separable bilinear resize
#   grid = (channel_blocks,)  -- reduction axis over C.
#   per channel block:   cam[s, h, w]  (+)=  sum_c grad * feat
#   last block:          relu -> per-score min/max normalize ->
#                        resized = R @ cam_s @ C^T   (two MXU matmuls) ->
#                        out = acc_in + resized      (acc aliased in/out)
# --------------------------------------------------------------------------
def _level_cam_kernel(acc_ref, grads_ref, feat_ref, rmat_ref, cmat_t_ref,
                      out_ref, cam_ref, *, n_scores):
    k = pl.program_id(0)
    nk = pl.num_programs(0)

    # channel-block partial CAM (bf16 inputs upcast to f32; f32 accumulation)
    g = grads_ref[...].astype(jnp.float32)               # (S, cb, hl, wl)
    f = feat_ref[...].astype(jnp.float32)                # (cb, hl, wl)
    contrib = jnp.sum(g * f[None, :, :, :], axis=1)      # (S, hl, wl)

    @pl.when(k == 0)
    def _():
        cam_ref[...] = contrib                           # assign (no zero+add pass)

    @pl.when(k > 0)
    def _():
        cam_ref[...] += contrib

    @pl.when(k == nk - 1)
    def _():
        # carry previous levels (aliased accumulator); padded score rows stay 0
        out_ref[...] = acc_ref[...]
        for s in range(n_scores):                        # static unroll, real scores
            cam = jnp.maximum(cam_ref[s], 0.0)           # ReLU, (hl, wl)
            mn = jnp.min(cam)
            mx = jnp.max(cam)
            cam_n = (cam - mn) / jnp.maximum(mx - mn, EPS)
            # separable bilinear resize to (H, W): rows then columns, on the MXU
            t = jnp.dot(rmat_ref[...], cam_n,
                        preferred_element_type=jnp.float32)        # (H, wl)
            r = jnp.dot(t, cmat_t_ref[...],
                        preferred_element_type=jnp.float32)        # (H, W)
            out_ref[:, s, :] = out_ref[:, s, :] + r


def level_cam_pallas(acc, grads_l, feat_l, r_mat, c_mat_t, n_scores):
    # acc:     (H, S_ACC, W) f32   running multi-level sum (aliased to output)
    # grads_l: (S, C, hl, wl) bf16, feat_l: (C, hl, wl) bf16
    # r_mat:   (H, hl) f32, c_mat_t: (wl, W) f32
    s, c, hl, wl = grads_l.shape
    h_img, s_acc, w_img = acc.shape
    # channel block: full C at demo sizes; bounds per-step VMEM at C=256.
    c_block = c if c <= 64 else 64
    assert c % c_block == 0
    nk = c // c_block
    kernel = functools.partial(_level_cam_kernel, n_scores=n_scores)
    return pl.pallas_call(
        kernel,
        out_shape=jax.ShapeDtypeStruct(acc.shape, jnp.float32),
        grid=(nk,),
        in_specs=[
            pl.BlockSpec((h_img, s_acc, w_img), lambda k: (0, 0, 0)),   # acc (resident)
            pl.BlockSpec((s, c_block, hl, wl), lambda k: (0, k, 0, 0)),  # grads
            pl.BlockSpec((c_block, hl, wl), lambda k: (k, 0, 0)),        # feat
            pl.BlockSpec((h_img, hl), lambda k: (0, 0)),                 # row resize mat
            pl.BlockSpec((wl, w_img), lambda k: (0, 0)),                 # col resize mat^T
        ],
        out_specs=pl.BlockSpec((h_img, s_acc, w_img), lambda k: (0, 0, 0)),
        scratch_shapes=[pltpu.VMEM((s, hl, wl), jnp.float32)],           # per-level CAM
        input_output_aliases={0: 0},                                     # acc in-place
        compiler_params=pltpu.CompilerParams(
            dimension_semantics=("arbitrary",),
            # tiny at demo shapes; size per generation (<=~56 MiB on v7x,
            # up to ~112 MiB on v5e/v6e) when tiling real Mask R-CNN shapes.
            vmem_limit_bytes=32 * 1024 * 1024,
        ),
    )(acc, grads_l, feat_l, r_mat, c_mat_t)


# --------------------------------------------------------------------------
# Kernel C: finalize -- mean over levels, per-score normalize, max over scores
# --------------------------------------------------------------------------
def _finalize_kernel(acc_ref, out_ref, *, n_levels, n_scores):
    inv_l = 1.0 / n_levels
    result = None
    for s in range(n_scores):                            # static unroll over scores
        m = acc_ref[:, s, :] * inv_l                     # (H, W), mean over levels
        mn = jnp.min(m)
        mx = jnp.max(m)
        nm = (m - mn) / jnp.maximum(mx - mn, EPS)
        result = nm if result is None else jnp.maximum(result, nm)
    out_ref[...] = result


def finalize_pallas(acc, n_levels, n_scores):
    h_img, _, w_img = acc.shape
    kernel = functools.partial(_finalize_kernel, n_levels=int(n_levels),
                               n_scores=int(n_scores))
    return pl.pallas_call(
        kernel,
        out_shape=jax.ShapeDtypeStruct((h_img, w_img), jnp.float32),
        in_specs=[pl.BlockSpec(memory_space=pltpu.MemorySpace.VMEM)],
        out_specs=pl.BlockSpec(memory_space=pltpu.MemorySpace.VMEM),
    )(acc)


# --------------------------------------------------------------------------
# Host-side helper: 1-D bilinear interpolation matrix (cv2.resize INTER_LINEAR
# half-pixel convention, clamped at borders).  Separable: out = R @ img @ C^T.
# --------------------------------------------------------------------------
def _bilinear_matrix(dst, src):
    m = np.zeros((dst, src), np.float32)
    scale = src / dst
    for i in range(dst):
        x = (i + 0.5) * scale - 0.5
        x = min(max(x, 0.0), src - 1.0)
        x0 = int(np.floor(x))
        x1 = min(x0 + 1, src - 1)
        w = x - x0
        m[i, x0] += 1.0 - w
        m[i, x1] += w
    return m


# --------------------------------------------------------------------------
# Forward wrapper reproducing the ODAM post-detector math
# --------------------------------------------------------------------------
def mask_rcnn_odam_forward(image, cls_logits, bboxes, features, grads,
                           target_class, target_box):
    h_img, w_img = int(image.shape[0]), int(image.shape[1])
    target_class = int(target_class)
    n_scores = int(grads[0].shape[0])
    n_levels = len(features)

    # --- fused proposal selection (softmax + gather + IoU*score + argmax) ----
    logits_t = jnp.transpose(cls_logits, (1, 0))                  # (C+1, N)
    boxes_t = jnp.transpose(bboxes[:, target_class], (1, 0))      # (4, N)
    idx = select_proposal_pallas(
        logits_t, boxes_t, target_box.astype(jnp.float32), target_class)
    # TODO(synk): in the reference, `idx` picks which scalar outputs get
    # backpropagated through mmdet; autograd through the detector has no Pallas
    # equivalent, so the per-score feature gradients arrive as inputs and idx
    # is not consumed further.
    _ = idx

    # --- per-level CAM + normalize + separable resize, accumulated in-place --
    acc = jnp.zeros((h_img, S_ACC, w_img), jnp.float32)
    for lvl, feat in enumerate(features):
        _, hl, wl = feat.shape
        r_mat = jnp.asarray(_bilinear_matrix(h_img, hl))          # (H, hl)
        c_mat_t = jnp.asarray(_bilinear_matrix(w_img, wl).T)      # (wl, W)
        acc = level_cam_pallas(acc,
                               grads[lvl].astype(jnp.bfloat16),
                               feat.astype(jnp.bfloat16),
                               r_mat, c_mat_t, n_scores)

    # --- mean over levels, per-score normalize, max over scores --------------
    return finalize_pallas(acc, n_levels, n_scores)


if __name__ == "__main__":
    key = jax.random.PRNGKey(0)
    k_img, k_log, k_xy, k_wh, k_feat, k_grad = jax.random.split(key, 6)

    # Small synthetic shapes consistent with the module's forward.
    H_IMG, W_IMG = 32, 32
    N_PROPOSALS = 128
    NUM_CLASSES = 4          # logits have num_classes + 1 columns
    N_SCORES = 5             # class score + 4 box coordinates
    C_FEAT = 8
    LEVEL_SIZES = [(16, 16), (8, 8), (4, 4)]   # x[:-2] -> 3 FPN levels

    image = jax.random.uniform(k_img, (H_IMG, W_IMG, 3), jnp.float32)

    # synthetic RoI-head outputs: class logits and decoded, rescaled boxes
    cls_logits = jax.random.normal(k_log, (N_PROPOSALS, NUM_CLASSES + 1),
                                   jnp.float32)
    xy1 = jax.random.uniform(k_xy, (N_PROPOSALS, NUM_CLASSES, 2),
                             jnp.float32, 0.0, 20.0)
    wh = jax.random.uniform(k_wh, (N_PROPOSALS, NUM_CLASSES, 2),
                            jnp.float32, 4.0, 12.0)
    xy2 = jnp.minimum(xy1 + wh, float(W_IMG))
    bboxes = jnp.concatenate([xy1, xy2], axis=-1)            # (N, num_cls, 4)

    # synthetic FPN features (batch squeezed -> CHW) and per-score gradients
    features = []
    grads = []
    for i, (h, w) in enumerate(LEVEL_SIZES):
        kf = jax.random.fold_in(k_feat, i)
        kg = jax.random.fold_in(k_grad, i)
        features.append(jax.random.normal(kf, (C_FEAT, h, w), jnp.float32))
        grads.append(jax.random.normal(kg, (N_SCORES, C_FEAT, h, w),
                                       jnp.float32))

    target_class = 1
    target_box = jnp.array([4.0, 4.0, 20.0, 20.0], jnp.float32)

    out = mask_rcnn_odam_forward(image, cls_logits, bboxes, features, grads,
                                 target_class, target_box)
    out = jax.block_until_ready(out)

    assert out.shape == (H_IMG, W_IMG)
    assert bool(jnp.isfinite(out).all())
    print("KERNEL_OK")
</pallas_src>

<mosaic_0001>
module attributes {stable_mosaic.version = 11 : i64} {
  func.func @_select_kernel(%arg0: memref<5x128xf32, #tpu.memory_space<vmem>>, %arg1: memref<4x128xf32, #tpu.memory_space<vmem>>, %arg2: memref<4xf32, #tpu.memory_space<smem>>, %arg3: memref<1xi32, #tpu.memory_space<smem>>) attributes {dimension_semantics = [], scalar_prefetch = 0 : i64, scratch_operands = 0 : i64, tpu.core_type = #tpu.core_type<tc>} {
    %c0 = arith.constant 0 : index
    %c0_0 = arith.constant 0 : index
    %0 = vector.load %arg0[%c0, %c0_0] : memref<5x128xf32, #tpu.memory_space<vmem>>, vector<5x128xf32>
    %cst = arith.constant dense<0xFF800000> : vector<128xf32>
    %1 = vector.multi_reduction <maximumf>, %0, %cst [0] : vector<5x128xf32> to vector<128xf32>
    %2 = vector.shape_cast %1 : vector<128xf32> to vector<1x128xf32>
    %3 = vector.broadcast %2 : vector<1x128xf32> to vector<5x128xf32>
    %4 = arith.subf %0, %3 : vector<5x128xf32>
    %5 = math.exp %4 : vector<5x128xf32>
    %cst_1 = arith.constant dense<0.000000e+00> : vector<128xf32>
    %6 = vector.multi_reduction <add>, %5, %cst_1 [0] : vector<5x128xf32> to vector<128xf32>
    %7 = vector.shape_cast %6 : vector<128xf32> to vector<1x128xf32>
    %8 = vector.extract_strided_slice %5 {offsets = [1, 0], sizes = [1, 128], strides = [1, 1]} : vector<5x128xf32> to vector<1x128xf32>
    %9 = arith.divf %8, %7 : vector<1x128xf32>
    %c0_2 = arith.constant 0 : index
    %c0_3 = arith.constant 0 : index
    %10 = vector.load %arg1[%c0_2, %c0_3] : memref<4x128xf32, #tpu.memory_space<vmem>>, vector<1x128xf32>
    %c1 = arith.constant 1 : index
    %c0_4 = arith.constant 0 : index
    %11 = vector.load %arg1[%c1, %c0_4] : memref<4x128xf32, #tpu.memory_space<vmem>>, vector<1x128xf32>
    %c2 = arith.constant 2 : index
    %c0_5 = arith.constant 0 : index
    %12 = vector.load %arg1[%c2, %c0_5] : memref<4x128xf32, #tpu.memory_space<vmem>>, vector<1x128xf32>
    %c3 = arith.constant 3 : index
    %c0_6 = arith.constant 0 : index
    %13 = vector.load %arg1[%c3, %c0_6] : memref<4x128xf32, #tpu.memory_space<vmem>>, vector<1x128xf32>
    %c0_7 = arith.constant 0 : index
    %14 = memref.load %arg2[%c0_7] : memref<4xf32, #tpu.memory_space<smem>>
    %c1_8 = arith.constant 1 : index
    %15 = memref.load %arg2[%c1_8] : memref<4xf32, #tpu.memory_space<smem>>
    %c2_9 = arith.constant 2 : index
    %16 = memref.load %arg2[%c2_9] : memref<4xf32, #tpu.memory_space<smem>>
    %c3_10 = arith.constant 3 : index
    %17 = memref.load %arg2[%c3_10] : memref<4xf32, #tpu.memory_space<smem>>
    %18 = vector.broadcast %16 : f32 to vector<1x128xf32>
    %19 = arith.minimumf %12, %18 : vector<1x128xf32>
    %20 = vector.broadcast %14 : f32 to vector<1x128xf32>
    %21 = arith.maximumf %10, %20 : vector<1x128xf32>
    %22 = arith.subf %19, %21 : vector<1x128xf32>
    %cst_11 = arith.constant 0.000000e+00 : f32
    %23 = vector.broadcast %cst_11 : f32 to vector<1x128xf32>
    %24 = arith.maximumf %22, %23 : vector<1x128xf32>
    %25 = vector.broadcast %17 : f32 to vector<1x128xf32>
    %26 = arith.minimumf %13, %25 : vector<1x128xf32>
    %27 = vector.broadcast %15 : f32 to vector<1x128xf32>
    %28 = arith.maximumf %11, %27 : vector<1x128xf32>
    %29 = arith.subf %26, %28 : vector<1x128xf32>
    %cst_12 = arith.constant 0.000000e+00 : f32
    %30 = vector.broadcast %cst_12 : f32 to vector<1x128xf32>
    %31 = arith.maximumf %29, %30 : vector<1x128xf32>
    %32 = arith.mulf %24, %31 : vector<1x128xf32>
    %33 = arith.subf %12, %10 : vector<1x128xf32>
    %34 = arith.subf %13, %11 : vector<1x128xf32>
    %35 = arith.mulf %33, %34 : vector<1x128xf32>
    %36 = arith.subf %16, %14 : f32
    %37 = arith.subf %17, %15 : f32
    %38 = arith.mulf %36, %37 : f32
    %39 = vector.broadcast %38 : f32 to vector<1x128xf32>
    %40 = arith.addf %35, %39 : vector<1x128xf32>
    %41 = arith.subf %40, %32 : vector<1x128xf32>
    %42 = arith.divf %32, %41 : vector<1x128xf32>
    %43 = arith.mulf %42, %9 : vector<1x128xf32>
    %44 = vector.shape_cast %43 : vector<1x128xf32> to vector<1x1x128xf32>
    %cst_13 = arith.constant dense<0xFF800000> : vector<1xf32>
    %45 = vector.multi_reduction <maximumf>, %44, %cst_13 [1, 2] : vector<1x1x128xf32> to vector<1xf32>
    %46 = vector.shape_cast %45 : vector<1xf32> to vector<1x1x1xf32>
    %47 = vector.extract %46[0, 0, 0] : f32 from vector<1x1x1xf32>
    %48 = tpu.iota {dimensions = array<i32: 1>} : vector<1x128xi32>
    %49 = vector.broadcast %47 : f32 to vector<1x128xf32>
    %50 = arith.cmpf oeq, %43, %49 : vector<1x128xf32>
    %c128_i32 = arith.constant 128 : i32
    %51 = vector.broadcast %c128_i32 : i32 to vector<1x128xi32>
    %52 = arith.select %50, %48, %51 : vector<1x128xi1>, vector<1x128xi32>
    %53 = vector.shape_cast %52 : vector<1x128xi32> to vector<1x1x128xi32>
    %cst_14 = arith.constant dense<2147483647> : vector<1xi32>
    %54 = vector.multi_reduction <minsi>, %53, %cst_14 [1, 2] : vector<1x1x128xi32> to vector<1xi32>
    %55 = vector.shape_cast %54 : vector<1xi32> to vector<1x1x1xi32>
    %56 = vector.extract %55[0, 0, 0] : i32 from vector<1x1x1xi32>
    %c0_15 = arith.constant 0 : index
    %57 = memref.load %arg3[%c0_15] : memref<1xi32, #tpu.memory_space<smem>>
    memref.store %56, %arg3[%c0_15] : memref<1xi32, #tpu.memory_space<smem>>
    return
  }
}

</mosaic_0001>

<bundles_post_ra>
// kernel: tpu_custom_call.1
= control target key start
LH: loop header
LB: loop body
LE: loop exit
PB: predicated region body
PF: predicated region fallthrough
CT: control target
= control target key end

     0   :  { %8 = vsyncpa [#allocation3], 0  ;;  %s326_s0 = inlined_call_operand.hbm [shape: f32[5,128], index: 0, kind: input, shape index: {}]   ;;  %s327_s1 = inlined_call_operand.hbm [shape: f32[4,128], index: 1, kind: input, shape index: {}]   ;;  %s328_s2 = inlined_call_operand.vmem [shape: f32[4], index: 2, kind: input, shape index: {}]   ;;  %s329_s3 = inlined_call_operand.hbm [shape: s32[1], index: 3, kind: output, shape index: {}]  }
   0x1   :  { %9 = vsyncpa [#allocation7], 0 }
   0x2   :  { %10 = vsyncpa [#allocation5], 0 }
   0x3   :  { %11 = vsyncpa [#allocation4], 0  ;;  %s259_s12 = smov [#allocation2]   ;;  %s260_s14 = smov [#allocation6]  }
   0x4   :  { %s18_s13 = sshll.u32 %s259_s12, 4  ;;  %s28_s15 = sshll.u32 %s260_s14, 4  ;;  %s19_s13 = int_to_ptr.vmem [resolvable:$true] %s18_s13  ;;  %s29_s15 = int_to_ptr.vmem [resolvable:$true] %s28_s15 }
   0x5   :  { %s185_s18 = scalar_lea.hbm %s326_s0, 128 }
   0x6   :  { %p186_p0 = scmp.ne.s32.totalorder %s326_s0, %s185_s18  ;;  %p189_p1 = scmp.lt.u32.totalorder %s185_s18, %s326_s0 }
   0x8   :  { %p191_p2 = pnand %p189_p1, %p186_p0 }
   0xa   :  { %194 = shalt.err (!%p191_p2)
}
   0xb   :  { %s195_s23 = scalar_lea.vmem %s19_s13, 128  ;;  %p200_p4 = scmp.lt.s32.totalorder %s19_s13, %s19_s13 }
   0xc   :  { %p196_p3 = scmp.ne.s32.totalorder %s19_s13, %s195_s23  ;;  %p201_p5 = scmp.lt.s32.totalorder %s195_s23, %s195_s23 }
   0xe   :  { %p202_p6 = por %p201_p5, %p200_p4 }
  0x10   :  { %p203_p7 = pnand %p202_p6, %p196_p3 }
  0x12   :  { %206 = shalt.err (!%p203_p7)
}
  0x13   :  { %21 = dma.hbm_to_vmem [thread:$0]  %s326_s0, 128, %s19_s13, [#allocation3]  }
  0x14   :  { %s207_s28 = scalar_lea.hbm %s327_s1, 64 }
  0x15   :  { %p208_p8 = scmp.ne.s32.totalorder %s327_s1, %s207_s28  ;;  %p211_p9 = scmp.lt.u32.totalorder %s207_s28, %s327_s1 }
  0x17   :  { %p213_p10 = pnand %p211_p9, %p208_p8 }
  0x19   :  { %216 = shalt.err (!%p213_p10)
}
  0x1a   :  { %s217_s6 = scalar_lea.vmem %s29_s15, 64  ;;  %p222_p12 = scmp.lt.s32.totalorder %s29_s15, %s29_s15 }
  0x1b   :  { %p218_p11 = scmp.ne.s32.totalorder %s29_s15, %s217_s6  ;;  %p223_p13 = scmp.lt.s32.totalorder %s217_s6, %s217_s6 }
  0x1d   :  { %p224_p0 = por %p223_p13, %p222_p12 }
  0x1f   :  { %p225_p1 = pnand %p224_p0, %p218_p11 }
  0x21   :  { %228 = shalt.err (!%p225_p1)
}
  0x22   :  { %31 = dma.hbm_to_vmem [thread:$0]  %s327_s1, 64, %s29_s15, [#allocation7]  }
  0x23   :  { %s38_s10 = sshll.u32 %s328_s2, 4  ;;  %s39_s10 = int_to_ptr.vmem [resolvable:$true] %s38_s10 }
  0x24   :  { %s229_s11 = scalar_lea.vmem %s39_s10, 16  ;;  %p234_p3 = scmp.lt.s32.totalorder %s39_s10, %s39_s10 }
  0x25   :  { %p230_p2 = scmp.ne.s32.totalorder %s39_s10, %s229_s11  ;;  %p235_p4 = scmp.lt.s32.totalorder %s229_s11, %s229_s11 }
  0x27   :  { %p236_p5 = por %p235_p4, %p234_p3 }
  0x29   :  { %p237_p6 = pnand %p236_p5, %p230_p2 }
  0x2b   :  { %240 = shalt.err (!%p237_p6)
}
  0x2c   :  { %s261_s12 = smov [#allocation8]  }
  0x2d   :  { %41 = dma.vmem_to_smem %s39_s10, 16, %s261_s12, [#allocation5]  }
  0x2e   :  { %251 = dma.done.wait [#allocation3], 128  }
  0x2f   :  { %252 = vsyncadd [#allocation3], 4294967168 }
  0x30   :  { %253 = dma.done.wait [#allocation7], 64  }
  0x31   :  { %254 = vsyncadd [#allocation7], 4294967232 }
  0x32   :  { %255 = dma.done.wait [#allocation5], 16  }
  0x33   :  { %256 = vsyncadd [#allocation5], 4294967280 }
  0x34   :  { %51 = sfence }
  0x35   :  { %v52_v0 = vld [vmem:[#allocation2] sm:$0x1f]  ;;  %vm53_vm0 = vcmask 1044480   ;;  %s77_s1 = sld [smem:[#allocation8]]  ;;  %s168_s2 = sld [smem:[#allocation8 + $0x1]]  ;;  %vm109_vm1 = vcmask 1040384   ;;  %v120_v55 = vlaneseq }
  0x36   :  { %v54_v1 = vsel %vm53_vm0, %v52_v0, -inf  ;;  %s169_s13 = sld [smem:[#allocation8 + $0x2]]  ;;  %s170_s14 = sld [smem:[#allocation8 + $0x3]]  ;;  %v73_v10 = vld [vmem:[#allocation6] sm:$0x1] }
  0x37   :  { %v55_v2 = vrot.slane %v54_v1, 4  ;;  %v74_v11 = vld [vmem:[#allocation6 + $0x1] sm:$0x1]  ;;  %v75_v12 = vld [vmem:[#allocation6 + $0x2] sm:$0x1]  ;;  %v121_v56 = vand.u32 127, %v120_v55 }
  0x38   :  { %v76_v13 = vld [vmem:[#allocation6 + $0x3] sm:$0x1]  ;;  %v94_v24 = vsub.f32 %v75_v12, %v73_v10  ;;  %s241_s22 = scalar_lea.hbm %s329_s3, 16 }
  0x39   :  { %v56_v3 = vmax.f32 %v54_v1, %v55_v2  ;;  %v95_v25 = vsub.f32 %v76_v13, %v74_v11  ;;  %p242_p7 = scmp.ne.s32.totalorder %s329_s3, %s241_s22  ;;  %p245_p8 = scmp.lt.u32.totalorder %s241_s22, %s329_s3 }
  0x3b   :  { %v57_v4 = vrot.slane %v56_v3, 2  ;;  %v83_v15 = vstv %s77_s1  ;;  %v89_v17 = vstv %s168_s2  ;;  %v96_v29 = vmul.f32 %v95_v25, %v94_v24  ;;  %p247_p9 = pnand %p245_p8, %p242_p7 }
  0x3c   :  { %v81_v14 = vstv %s169_s13  ;;  %v87_v16 = vstv %s170_s14  ;;  %v84_v19 = vmax.f32 %v73_v10, %v83_v15  ;;  %v90_v21 = vmax.f32 %v74_v11, %v89_v17  ;;  %s97_s15 = ssub.f32 %s169_s13, %s77_s1 }
  0x3d   :  { %v58_v5 = vmax.f32 %v56_v3, %v57_v4  ;;  %v82_v18 = vmin.f32 %v75_v12, %v81_v14  ;;  %v88_v20 = vmin.f32 %v76_v13, %v87_v16  ;;  %s98_s16 = ssub.f32 %s170_s14, %s168_s2 }
  0x3f   :  { %v59_v6 = vrot.slane %v58_v5, 1  ;;  %v85_v22 = vsub.f32 %v82_v18, %v84_v19  ;;  %v91_v23 = vsub.f32 %v88_v20, %v90_v21  ;;  %s99_s17 = smul.f32 %s98_s16, %s97_s15 }
  0x41   :  { %v60_v7 = vmax.f32 %v58_v5, %v59_v6  ;;  %v86_v27 = vmax.f32 %v85_v22, 0.0  ;;  %v92_v28 = vmax.f32 %v91_v23, 0.0  ;;  %v100_v31 = vstv %s99_s17 }
  0x42   :  { %v101_v35 = vadd.f32 %v100_v31, %v96_v29 }
  0x43   :  { %v61_v8 = vsub.f32 %v52_v0, %v60_v7  ;;  %v93_v34 = vmul.f32 %v92_v28, %v86_v27 }
  0x45   :  { %v62_v9 = vmul.f32 1.442695, %v61_v8  ;;  %v102_v38 = vsub.f32 %v101_v35, %v93_v34 }
  0x47   :  { %179 = vpow2.f32 %v62_v9 }
  0x48   :  { %181 = vrcp.f32 %v102_v38 }
  0x51   :  { %v180_v26 = vpop.eup %179 }
  0x52   :  { %v64_v30 = vsel %vm53_vm0, %v180_v26, 0.0  ;;  %v182_v41 = vpop.eup %181 }
  0x53   :  { %v65_v32 = vrot.slane %v64_v30, 4  ;;  %v104_v44 = vmul.f32 %v182_v41, %v93_v34 }
  0x55   :  { %v66_v33 = vadd.f32 %v65_v32, %v64_v30 }
  0x57   :  { %v67_v36 = vrot.slane %v66_v33, 2 }
  0x59   :  { %v68_v37 = vadd.f32 %v67_v36, %v66_v33 }
  0x5b   :  { %v69_v39 = vrot.slane %v68_v37, 1 }
  0x5d   :  { %v70_v40 = vadd.f32 %v69_v39, %v68_v37 }
  0x5f   :  { %183 = vrcp.f32 %v70_v40 }
  0x69   :  { %v184_v42 = vpop.eup %183 }
  0x6a   :  { %v72_v43 = vmul.f32 %v184_v42, %v180_v26 }
  0x6c   :  { %v106_v45 = vrot.slane %v72_v43, 1 }
  0x6e   :  { %v108_v46 = vmul.f32 %v106_v45, %v104_v44 }
  0x70   :  { %v110_v47 = vsel %vm109_vm1, %v108_v46, -inf }
  0x71   :  { %111 = vmax.xlane.f32.xlu0 %v110_v47 }
  0xfe   :  { %v112_v48 = vpop.xlane.xlu0 %111 }
  0xff   :  { %v113_v49 = vrot.slane %v112_v48, 4 }
 0x101   :  { %v114_v50 = vmax.f32 %v112_v48, %v113_v49 }
 0x103   :  { %v115_v51 = vrot.slane %v114_v50, 2 }
 0x105   :  { %v116_v52 = vmax.f32 %v114_v50, %v115_v51 }
 0x107   :  { %v117_v53 = vrot.slane %v116_v52, 1 }
 0x109   :  { %v118_v54 = vmax.f32 %v116_v52, %v117_v53 }
 0x10b   :  { %171 = vpush %v118_v54 }
 0x13c   :  { %s172_s18 = spop %171 }
 0x13d   :  { %v122_v57 = vstv %s172_s18 }
 0x13e   :  { %vm123_vm2 = vcmp.eq.f32.partialorder %v108_v46, %v122_v57 }
 0x13f   :  { %v124_v58 = vsel %vm123_vm2, %v121_v56, 128 }
 0x140   :  { %v125_v59 = vsel %vm109_vm1, %v124_v58, 2147483647 }
 0x141   :  { %v127_v60 = vshra.s32 %v125_v59, 16  ;;  %v126_v62 = vand.u32 65535, %v125_v59 }
 0x143   :  { %v129_v61 = vcvt.s32.f32 %v127_v60  ;;  %v128_v0 = vcvt.s32.f32 %v126_v62 }
 0x145   :  { %130 = vmin.xlane.f32.xlu0 %v129_v61 }
 0x1d2   :  { %v131_v63 = vpop.xlane.xlu0 %130 }
 0x1d3   :  { %vm132_vm3 = vcmp.eq.f32.partialorder %v129_v61, %v131_v63  ;;  %v137_v2 = vcvt.f32.s32 %v131_v63 }
 0x1d4   :  { %v133_v1 = vsel %vm132_vm3, %v128_v0, inf }
 0x1d5   :  { %134 = vmin.xlane.f32.xlu1 %v133_v1  ;;  %v138_v4 = vshll.u32 %v137_v2, 16 }
 0x262   :  { %v135_v3 = vpop.xlane.xlu1 %134 }
 0x263   :  { %v136_v5 = vcvt.f32.s32 %v135_v3 }
 0x265   :  { %v139_v6 = vadd.s32 %v138_v4, %v136_v5 }
 0x267   :  { %v140_v7 = vrot.slane %v139_v6, 4 }
 0x269   :  { %vm141_vm4 = vcmp.lt.s32.totalorder %v139_v6, %v140_v7 }
 0x26a   :  { %v142_v8 = vsel %vm141_vm4, %v139_v6, %v140_v7 }
 0x26b   :  { %v143_v9 = vrot.slane %v142_v8, 2 }
 0x26d   :  { %vm144_vm5 = vcmp.lt.s32.totalorder %v142_v8, %v143_v9 }
 0x26e   :  { %v145_v10 = vsel %vm144_vm5, %v142_v8, %v143_v9 }
 0x26f   :  { %v146_v11 = vrot.slane %v145_v10, 1 }
 0x271   :  { %vm147_vm6 = vcmp.lt.s32.totalorder %v145_v10, %v146_v11 }
 0x272   :  { %v148_v12 = vsel %vm147_vm6, %v145_v10, %v146_v11 }
 0x273   :  { %173 = vpush %v148_v12 }
 0x2a4   :  { %s174_s19 = spop %173 }
 0x2a5   :  { %151 = sst [smem:[#allocation9]] %s174_s19 }
 0x2a6   :  { %250 = shalt.err (!%p247_p9)
}
 0x2a7   :  { %s262_s27 = smov [#allocation9]  }
 0x2a8   :  { %159 = dma.smem_to_hbm %s262_s27, 16, %s329_s3, [#allocation4]  }
 0x2a9   :  { %257 = dma.done.wait [#allocation4], 16  }
 0x2aa   :  { %258 = vsyncadd [#allocation4], 4294967280 }
 0x2ab   :  { %163 = sfence }
 0x2ac   :  { %164 = vsyncpa [#allocation3], 1 }
 0x2ad   :  { %165 = vsyncpa [#allocation7], 1 }
 0x2ae   :  { %166 = vsyncpa [#allocation4], 1 }
 0x2af   :  { %167 = vsyncpa [#allocation5], 1 }

</bundles_post_ra>
